<compile_context>
chip_gen: v7x
topology: tpu7x:2x2x1
jax: 0.10.0
libtpu: 0.0.40
codegen_flags: <defaults>
</compile_context>

<pallas_src>
import functools

import jax
import jax.numpy as jnp
from jax.experimental import pallas as pl
from jax.experimental.pallas import tpu as pltpu

EPS = 1e-5


# ----------------------------- kernels -------------------------------------


def gcn_fused_kernel(a_ref, hk_ref, hi_ref, wg_ref, bg_ref, wr_ref, br_ref,
                     x_ref, stats_ref, acc_ref):
    """Tiled GraphConv(norm=False) + residual Linear + ReLU + BN partial stats.

    Grid: (row tiles i [parallel], source-node reduction tiles k [arbitrary]).
      a_ref  : (tm, tk)   bf16 adjacency tile A[i-rows, k-cols]
      hk_ref : (tk, Fin)  bf16 source-node features (varies with k)
      hi_ref : (tm, Fin)  bf16 dest-node features (varies with i only; residual)
      wg/wr  : (Fin, Fout) bf16 weights;  bg/br: (1, Fout) f32 biases
      x_ref  : (tm, Fout) f32 pre-BN activations (written on last k)
      stats_ref: (1, 2, Fout) f32 per-row-tile [sum, sum_sq] (written on last k)
      acc_ref: (tm, Fin) f32 aggregation accumulator (VMEM scratch)
    """
    k = pl.program_id(1)
    nk = pl.num_programs(1)

    @pl.when(k == 0)
    def _():
        acc_ref[...] = jnp.zeros_like(acc_ref)

    # Aggregation in input-feature space (Fin <= Fout here, so this is the cheap
    # order):  acc += A[i, k] @ H[k]   — bf16 MXU operands, f32 accumulation.
    acc_ref[...] += jnp.dot(a_ref[...], hk_ref[...],
                            preferred_element_type=jnp.float32)

    @pl.when(k == nk - 1)
    def _():
        # GraphConv projection + bias + ReLU.
        conv = jnp.dot(acc_ref[...].astype(jnp.bfloat16), wg_ref[...],
                       preferred_element_type=jnp.float32)
        conv = jnp.maximum(conv + bg_ref[...], 0.0)
        # Residual branch: relu(Linear(H[i-tile])).
        res = jnp.dot(hi_ref[...], wr_ref[...],
                      preferred_element_type=jnp.float32)
        res = jnp.maximum(res + br_ref[...], 0.0)
        x = conv + res                      # dropout(p=0.0) == identity
        x_ref[...] = x
        # Per-row-tile BatchNorm partial statistics (reduced in the BN pass).
        sum_x = jnp.sum(x, axis=0, keepdims=True)          # (1, Fout)
        sum_x2 = jnp.sum(x * x, axis=0, keepdims=True)     # (1, Fout)
        stats_ref[...] = jnp.concatenate([sum_x, sum_x2], axis=0)[None]


def bn_kernel(stats_ref, x_ref, gamma_ref, beta_ref, out_ref, *, n_nodes):
    """Row-tiled BatchNorm1d (training mode) using the reduced global stats."""
    s = jnp.sum(stats_ref[...], axis=0)                    # (2, Fout)
    inv_n = 1.0 / n_nodes
    mean = s[0:1, :] * inv_n                               # (1, Fout)
    var = jnp.maximum(s[1:2, :] * inv_n - mean * mean, 0.0)
    out_ref[...] = (gamma_ref[...] * (x_ref[...] - mean)
                    * jax.lax.rsqrt(var + EPS) + beta_ref[...])


# ----------------------------- wrapper --------------------------------------


def _pick_tile(n, target):
    return target if (n % target == 0) else n


def gcn_layer(adj, feats, wg, bg, wr, br, gamma, beta, *,
              row_tile=128, k_tile=128):
    """GCNLayer forward.  adj: (N, N) dense A[dst, src] incl. self loops."""
    n, fin = feats.shape
    fout = wg.shape[1]
    tm = _pick_tile(n, row_tile)
    tk = _pick_tile(n, k_tile)
    n_rt = n // tm
    n_kt = n // tk

    # bf16 operands for the MXU matmuls (f32 accumulation inside the kernels).
    a_bf = adj.astype(jnp.bfloat16)
    h_bf = feats.astype(jnp.bfloat16)
    wg_bf = wg.astype(jnp.bfloat16)
    wr_bf = wr.astype(jnp.bfloat16)

    compiler_params = pltpu.CompilerParams(
        dimension_semantics=("parallel", "arbitrary"),
        vmem_limit_bytes=32 * 1024 * 1024)

    x, stats = pl.pallas_call(
        gcn_fused_kernel,
        out_shape=(jax.ShapeDtypeStruct((n, fout), jnp.float32),
                   jax.ShapeDtypeStruct((n_rt, 2, fout), jnp.float32)),
        grid_spec=pltpu.PrefetchScalarGridSpec(
            num_scalar_prefetch=0,
            grid=(n_rt, n_kt),
            in_specs=[
                pl.BlockSpec((tm, tk), lambda i, k: (i, k)),     # A tile
                pl.BlockSpec((tk, fin), lambda i, k: (k, 0)),    # H source rows
                pl.BlockSpec((tm, fin), lambda i, k: (i, 0)),    # H dest rows
                pl.BlockSpec((fin, fout), lambda i, k: (0, 0)),  # Wg
                pl.BlockSpec((1, fout), lambda i, k: (0, 0)),    # bg
                pl.BlockSpec((fin, fout), lambda i, k: (0, 0)),  # Wr
                pl.BlockSpec((1, fout), lambda i, k: (0, 0)),    # br
            ],
            out_specs=[
                pl.BlockSpec((tm, fout), lambda i, k: (i, 0)),       # x
                pl.BlockSpec((1, 2, fout), lambda i, k: (i, 0, 0)),  # partial stats
            ],
            scratch_shapes=[pltpu.VMEM((tm, fin), jnp.float32)],
        ),
        compiler_params=compiler_params,
    )(a_bf, h_bf, h_bf, wg_bf, bg, wr_bf, br)

    out = pl.pallas_call(
        functools.partial(bn_kernel, n_nodes=float(n)),
        out_shape=jax.ShapeDtypeStruct((n, fout), jnp.float32),
        grid_spec=pltpu.PrefetchScalarGridSpec(
            num_scalar_prefetch=0,
            grid=(n_rt,),
            in_specs=[
                pl.BlockSpec((n_rt, 2, fout), lambda i: (0, 0, 0)),  # all partial stats
                pl.BlockSpec((tm, fout), lambda i: (i, 0)),          # x tile
                pl.BlockSpec((1, fout), lambda i: (0, 0)),           # gamma
                pl.BlockSpec((1, fout), lambda i: (0, 0)),           # beta
            ],
            out_specs=pl.BlockSpec((tm, fout), lambda i: (i, 0)),
        ),
        compiler_params=pltpu.CompilerParams(
            dimension_semantics=("parallel",),
            vmem_limit_bytes=32 * 1024 * 1024),
    )(stats, x, gamma, beta)
    return out


# ----------------------------- reference ------------------------------------


def gcn_layer_ref(adj, feats, wg, bg, wr, br, gamma, beta):
    conv = jnp.maximum(adj @ feats @ wg + bg, 0.0)
    res = jnp.maximum(feats @ wr + br, 0.0)
    x = conv + res
    mean = jnp.mean(x, axis=0, keepdims=True)
    var = jnp.mean((x - mean) ** 2, axis=0, keepdims=True)
    return gamma * (x - mean) * jax.lax.rsqrt(var + EPS) + beta


# ----------------------------- main ------------------------------------------


if __name__ == "__main__":
    key = jax.random.PRNGKey(0)
    k_adj, k_feat, k_wg, k_bg, k_wr, k_br = jax.random.split(key, 6)

    # Small batched molecular graph (block-diagonal adjacency with self loops).
    N = 256            # total atoms in the batch
    B = 8              # molecules
    IN_FEATS = 64
    OUT_FEATS = 128    # lane-dense / MXU-aligned output feature width

    nodes_per_mol = N // B
    mol_id = jnp.repeat(jnp.arange(B), nodes_per_mol)
    block_mask = (mol_id[:, None] == mol_id[None, :]).astype(jnp.float32)
    rand_adj = (jax.random.uniform(k_adj, (N, N)) < 0.15).astype(jnp.float32)
    adj = jnp.minimum(rand_adj * block_mask + jnp.eye(N, dtype=jnp.float32), 1.0)

    feats = jax.random.normal(k_feat, (N, IN_FEATS), jnp.float32)

    wg = jax.random.normal(k_wg, (IN_FEATS, OUT_FEATS), jnp.float32) / jnp.sqrt(IN_FEATS)
    bg = jax.random.normal(k_bg, (1, OUT_FEATS), jnp.float32) * 0.01
    wr = jax.random.normal(k_wr, (IN_FEATS, OUT_FEATS), jnp.float32) / jnp.sqrt(IN_FEATS)
    br = jax.random.normal(k_br, (1, OUT_FEATS), jnp.float32) * 0.01
    gamma = jnp.ones((1, OUT_FEATS), jnp.float32)
    beta = jnp.zeros((1, OUT_FEATS), jnp.float32)

    out = gcn_layer(adj, feats, wg, bg, wr, br, gamma, beta)
    out = jax.block_until_ready(out)

    assert out.shape == (N, OUT_FEATS), out.shape
    assert bool(jnp.all(jnp.isfinite(out))), "non-finite output"

    # Loose check vs pure-JAX f32 reference (kernel uses bf16 matmul operands).
    ref = gcn_layer_ref(adj, feats, wg, bg, wr, br, gamma, beta)
    max_diff = float(jnp.max(jnp.abs(out - ref)))
    assert max_diff < 0.25, f"max abs diff vs reference too large: {max_diff}"

    print("KERNEL_OK")
</pallas_src>

<mosaic_0001>
module attributes {stable_mosaic.version = 11 : i64} {
  func.func @gcn_fused_kernel(%arg0: i32, %arg1: i32, %arg2: memref<128x128xbf16, #tpu.memory_space<vmem>>, %arg3: memref<128x64xbf16, #tpu.memory_space<vmem>>, %arg4: memref<128x64xbf16, #tpu.memory_space<vmem>>, %arg5: memref<64x128xbf16, #tpu.memory_space<vmem>>, %arg6: memref<1x128xf32, #tpu.memory_space<vmem>>, %arg7: memref<64x128xbf16, #tpu.memory_space<vmem>>, %arg8: memref<1x128xf32, #tpu.memory_space<vmem>>, %arg9: memref<128x128xf32, #tpu.memory_space<vmem>>, %arg10: memref<1x2x128xf32, #tpu.memory_space<vmem>>, %arg11: memref<128x64xf32, #tpu.memory_space<vmem>>) attributes {dimension_semantics = [#tpu.dimension_semantics<parallel>, #tpu.dimension_semantics<arbitrary>], iteration_bounds = array<i64: 2, 2>, scalar_prefetch = 0 : i64, scratch_operands = 1 : i64, tpu.core_type = #tpu.core_type<tc>, window_params = [{transform_indices = @transform_0, window_bounds = array<i64: 128, 128>}, {transform_indices = @transform_1, window_bounds = array<i64: 128, 64>}, {transform_indices = @transform_2, window_bounds = array<i64: 128, 64>}, {pipeline_mode = #tpu.pipeline_mode<synchronous>, transform_indices = @transform_3, window_bounds = array<i64: 64, 128>}, {pipeline_mode = #tpu.pipeline_mode<synchronous>, transform_indices = @transform_4, window_bounds = array<i64: 1, 128>}, {pipeline_mode = #tpu.pipeline_mode<synchronous>, transform_indices = @transform_5, window_bounds = array<i64: 64, 128>}, {pipeline_mode = #tpu.pipeline_mode<synchronous>, transform_indices = @transform_6, window_bounds = array<i64: 1, 128>}, {transform_indices = @transform_7, window_bounds = array<i64: 128, 128>}, {transform_indices = @transform_8, window_bounds = array<i64: 1, 2, 128>}]} {
    %c0_i32 = arith.constant 0 : i32
    %0 = arith.cmpi eq, %arg1, %c0_i32 : i32
    %1 = arith.extui %0 : i1 to i32
    %c0_i32_0 = arith.constant 0 : i32
    %2 = arith.cmpi ne, %1, %c0_i32_0 : i32
    scf.if %2 {
      %cst_9 = arith.constant 0.000000e+00 : f32
      %12 = vector.broadcast %cst_9 : f32 to vector<128x64xf32>
      %c0_10 = arith.constant 0 : index
      %c0_11 = arith.constant 0 : index
      %13 = vector.load %arg11[%c0_10, %c0_11] : memref<128x64xf32, #tpu.memory_space<vmem>>, vector<128x64xf32>
      tpu.vector_store %arg11[%c0_10, %c0_11], %12 {strides = array<i32>} : memref<128x64xf32, #tpu.memory_space<vmem>>, vector<128x64xf32>,
    } else {
    }
    %c0 = arith.constant 0 : index
    %c0_1 = arith.constant 0 : index
    %3 = vector.load %arg11[%c0, %c0_1] : memref<128x64xf32, #tpu.memory_space<vmem>>, vector<128x64xf32>
    %c0_2 = arith.constant 0 : index
    %c0_3 = arith.constant 0 : index
    %4 = vector.load %arg2[%c0_2, %c0_3] : memref<128x128xbf16, #tpu.memory_space<vmem>>, vector<128x128xbf16>
    %c0_4 = arith.constant 0 : index
    %c0_5 = arith.constant 0 : index
    %5 = vector.load %arg3[%c0_4, %c0_5] : memref<128x64xbf16, #tpu.memory_space<vmem>>, vector<128x64xbf16>
    %cst = arith.constant dense<0.000000e+00> : vector<128x64xf32>
    %6 = tpu.matmul %4, %5, %cst {dimension_numbers = #tpu.dot_dimension_numbers<[1], [0], [0], [1], [0, 0, 1, 1], [], []>} : vector<128x128xbf16>, vector<128x64xbf16>, vector<128x64xf32> -> vector<128x64xf32>
    %7 = arith.addf %3, %6 : vector<128x64xf32>
    %c0_6 = arith.constant 0 : index
    %c0_7 = arith.constant 0 : index
    %8 = vector.load %arg11[%c0_6, %c0_7] : memref<128x64xf32, #tpu.memory_space<vmem>>, vector<128x64xf32>
    tpu.vector_store %arg11[%c0_6, %c0_7], %7 {strides = array<i32>} : memref<128x64xf32, #tpu.memory_space<vmem>>, vector<128x64xf32>,
    %c1_i32 = arith.constant 1 : i32
    %9 = arith.cmpi eq, %arg1, %c1_i32 : i32
    %10 = arith.extui %9 : i1 to i32
    %c0_i32_8 = arith.constant 0 : i32
    %11 = arith.cmpi ne, %10, %c0_i32_8 : i32
    scf.if %11 {
      %c0_9 = arith.constant 0 : index
      %c0_10 = arith.constant 0 : index
      %12 = vector.load %arg11[%c0_9, %c0_10] : memref<128x64xf32, #tpu.memory_space<vmem>>, vector<128x64xf32>
      %13 = arith.truncf %12 : vector<128x64xf32> to vector<128x64xbf16>
      %c0_11 = arith.constant 0 : index
      %c0_12 = arith.constant 0 : index
      %14 = vector.load %arg5[%c0_11, %c0_12] : memref<64x128xbf16, #tpu.memory_space<vmem>>, vector<64x128xbf16>
      %cst_13 = arith.constant dense<0.000000e+00> : vector<128x128xf32>
      %15 = tpu.matmul %13, %14, %cst_13 {dimension_numbers = #tpu.dot_dimension_numbers<[1], [0], [0], [1], [0, 0, 1, 1], [], []>} : vector<128x64xbf16>, vector<64x128xbf16>, vector<128x128xf32> -> vector<128x128xf32>
      %c0_14 = arith.constant 0 : index
      %c0_15 = arith.constant 0 : index
      %16 = vector.load %arg6[%c0_14, %c0_15] : memref<1x128xf32, #tpu.memory_space<vmem>>, vector<1x128xf32>
      %17 = vector.broadcast %16 : vector<1x128xf32> to vector<128x128xf32>
      %18 = arith.addf %15, %17 : vector<128x128xf32>
      %cst_16 = arith.constant 0.000000e+00 : f32
      %19 = vector.broadcast %cst_16 : f32 to vector<128x128xf32>
      %20 = arith.maximumf %18, %19 : vector<128x128xf32>
      %c0_17 = arith.constant 0 : index
      %c0_18 = arith.constant 0 : index
      %21 = vector.load %arg4[%c0_17, %c0_18] : memref<128x64xbf16, #tpu.memory_space<vmem>>, vector<128x64xbf16>
      %c0_19 = arith.constant 0 : index
      %c0_20 = arith.constant 0 : index
      %22 = vector.load %arg7[%c0_19, %c0_20] : memref<64x128xbf16, #tpu.memory_space<vmem>>, vector<64x128xbf16>
      %cst_21 = arith.constant dense<0.000000e+00> : vector<128x128xf32>
      %23 = tpu.matmul %21, %22, %cst_21 {dimension_numbers = #tpu.dot_dimension_numbers<[1], [0], [0], [1], [0, 0, 1, 1], [], []>} : vector<128x64xbf16>, vector<64x128xbf16>, vector<128x128xf32> -> vector<128x128xf32>
      %c0_22 = arith.constant 0 : index
      %c0_23 = arith.constant 0 : index
      %24 = vector.load %arg8[%c0_22, %c0_23] : memref<1x128xf32, #tpu.memory_space<vmem>>, vector<1x128xf32>
      %25 = vector.broadcast %24 : vector<1x128xf32> to vector<128x128xf32>
      %26 = arith.addf %23, %25 : vector<128x128xf32>
      %cst_24 = arith.constant 0.000000e+00 : f32
      %27 = vector.broadcast %cst_24 : f32 to vector<128x128xf32>
      %28 = arith.maximumf %26, %27 : vector<128x128xf32>
      %29 = arith.addf %20, %28 : vector<128x128xf32>
      %c0_25 = arith.constant 0 : index
      %c0_26 = arith.constant 0 : index
      %30 = vector.load %arg9[%c0_25, %c0_26] : memref<128x128xf32, #tpu.memory_space<vmem>>, vector<128x128xf32>
      tpu.vector_store %arg9[%c0_25, %c0_26], %29 {strides = array<i32>} : memref<128x128xf32, #tpu.memory_space<vmem>>, vector<128x128xf32>,
      %cst_27 = arith.constant dense<0.000000e+00> : vector<128xf32>
      %31 = vector.multi_reduction <add>, %29, %cst_27 [0] : vector<128x128xf32> to vector<128xf32>
      %32 = vector.shape_cast %31 : vector<128xf32> to vector<1x128xf32>
      %33 = arith.mulf %29, %29 : vector<128x128xf32>
      %cst_28 = arith.constant dense<0.000000e+00> : vector<128xf32>
      %34 = vector.multi_reduction <add>, %33, %cst_28 [0] : vector<128x128xf32> to vector<128xf32>
      %35 = vector.shape_cast %34 : vector<128xf32> to vector<1x128xf32>
      %36 = tpu.concatenate %32, %35 in 0 : vector<1x128xf32>, vector<1x128xf32> -> vector<2x128xf32>
      %37 = vector.shape_cast %36 : vector<2x128xf32> to vector<1x2x128xf32>
      %c0_29 = arith.constant 0 : index
      %c0_30 = arith.constant 0 : index
      %c0_31 = arith.constant 0 : index
      %38 = vector.load %arg10[%c0_29, %c0_30, %c0_31] : memref<1x2x128xf32, #tpu.memory_space<vmem>>, vector<1x2x128xf32>
      tpu.vector_store %arg10[%c0_29, %c0_30, %c0_31], %37 {strides = array<i32>} : memref<1x2x128xf32, #tpu.memory_space<vmem>>, vector<1x2x128xf32>,
    } else {
    }
    return
  }
  func.func @transform_0(%arg0: i32, %arg1: i32) -> (i32, i32) {
    %c0_i32 = arith.constant 0 : i32
    return %arg0, %arg1 : i32, i32
  }
  func.func @transform_1(%arg0: i32, %arg1: i32) -> (i32, i32) {
    %c0_i32 = arith.constant 0 : i32
    %c0_i32_0 = arith.constant 0 : i32
    return %arg1, %c0_i32 : i32, i32
  }
  func.func @transform_2(%arg0: i32, %arg1: i32) -> (i32, i32) {
    %c0_i32 = arith.constant 0 : i32
    %c0_i32_0 = arith.constant 0 : i32
    return %arg0, %c0_i32 : i32, i32
  }
  func.func @transform_3(%arg0: i32, %arg1: i32) -> (i32, i32) {
    %c0_i32 = arith.constant 0 : i32
    %c0_i32_0 = arith.constant 0 : i32
    %c0_i32_1 = arith.constant 0 : i32
    return %c0_i32, %c0_i32_0 : i32, i32
  }
  func.func @transform_4(%arg0: i32, %arg1: i32) -> (i32, i32) {
    %c0_i32 = arith.constant 0 : i32
    %c0_i32_0 = arith.constant 0 : i32
    %c0_i32_1 = arith.constant 0 : i32
    return %c0_i32, %c0_i32_0 : i32, i32
  }
  func.func @transform_5(%arg0: i32, %arg1: i32) -> (i32, i32) {
    %c0_i32 = arith.constant 0 : i32
    %c0_i32_0 = arith.constant 0 : i32
    %c0_i32_1 = arith.constant 0 : i32
    return %c0_i32, %c0_i32_0 : i32, i32
  }
  func.func @transform_6(%arg0: i32, %arg1: i32) -> (i32, i32) {
    %c0_i32 = arith.constant 0 : i32
    %c0_i32_0 = arith.constant 0 : i32
    %c0_i32_1 = arith.constant 0 : i32
    return %c0_i32, %c0_i32_0 : i32, i32
  }
  func.func @transform_7(%arg0: i32, %arg1: i32) -> (i32, i32) {
    %c0_i32 = arith.constant 0 : i32
    %c0_i32_0 = arith.constant 0 : i32
    return %arg0, %c0_i32 : i32, i32
  }
  func.func @transform_8(%arg0: i32, %arg1: i32) -> (i32, i32, i32) {
    %c0_i32 = arith.constant 0 : i32
    %c0_i32_0 = arith.constant 0 : i32
    %c0_i32_1 = arith.constant 0 : i32
    return %arg0, %c0_i32, %c0_i32_0 : i32, i32, i32
  }
}

</mosaic_0001>

<bundles_post_ra>
// kernel: tpu_custom_call.1
= control target key start
LH: loop header
LB: loop body
LE: loop exit
PB: predicated region body
PF: predicated region fallthrough
CT: control target
= control target key end

     0   :  { %s2399_s0 = inlined_call_operand.vmem [shape: bf16[256,256], index: 0, kind: input, shape index: {}]   ;;  %s2400_s1 = inlined_call_operand.vmem [shape: bf16[256,64], index: 1, kind: input, shape index: {}]   ;;  %s2401_s2 = inlined_call_operand.vmem [shape: bf16[256,64], index: 2, kind: input, shape index: {}]   ;;  %s2402_s3 = inlined_call_operand.vmem [shape: bf16[64,128], index: 3, kind: input, shape index: {}]   ;;  %s2403_s4 = inlined_call_operand.vmem [shape: f32[1,128], index: 4, kind: input, shape index: {}]   ;;  %s2404_s5 = inlined_call_operand.vmem [shape: bf16[64,128], index: 5, kind: input, shape index: {}]   ;;  %s2405_s6 = inlined_call_operand.vmem [shape: f32[1,128], index: 6, kind: input, shape index: {}]   ;;  %s2406_s7 = inlined_call_operand.hbm [shape: f32[256,128], index: 7, kind: output, shape index: {0}]   ;;  %s2407_s8 = inlined_call_operand.hbm [shape: f32[2,2,128], index: 8, kind: output, shape index: {1}]  }
   0x1   :  { %2415 = sst [smem:[#allocation19_spill]] %s2399_s0 }
   0x2   :  { %14 = vsyncpa [#allocation5], 0 }
   0x3   :  { %16 = vsyncpa [#allocation5 + $0x1], 0 }
   0x4   :  { %17 = vsyncpa [#allocation7], 0 }
   0x5   :  { %19 = vsyncpa [#allocation7 + $0x1], 0  ;;  %s2007_s27 = smov 0   ;;  %s2009_s28 = smov 0  }
   0x6   :  { %s2011_s29 = smov 0   ;;  %s2013_s30 = smov 0  }
   0x7   :  { %s2015_s9 = smov 0   ;;  %s2017_s10 = smov 0  }
   0x8   :  { %s2019_s11 = smov 0   ;;  %s2021_s12 = smov 0  }
   0x9   :  { %s2023_s13 = smov 0   ;;  %s2025_s14 = smov 0  }
   0xa LB: > { %2416 = sst [smem:[#allocation10_spill]] %s1919_s27  ;;  %s1473_s15 = sadd.s32 4294967295, %s1955_s14   ;;  %s1955_s14 = sphi %s2025_s14, %s25_s14   ;;  %s1951_s13 = sphi %s2023_s13, %s2437_s13   ;;  %s1947_s12 = sphi %s2021_s12, %s2436_s12   ;;  %s1943_s11 = sphi %s2019_s11, %s2435_s11   ;;  %s1939_s10 = sphi %s2017_s10, %s2434_s10   ;;  %s1935_s9 = sphi %s2015_s9, %s2433_s9   ;;  %s1931_s30 = sphi %s2013_s30, %s2432_s30   ;;  %s1927_s29 = sphi %s2011_s29, %s2440_s29   ;;  %s1923_s28 = sphi %s2009_s28, %s2439_s28   ;;  %s1919_s27 = sphi %s2007_s27, %s2438_s27  }
   0xb   : > { %2417 = sst [smem:[#allocation11_spill]] %s1935_s9  ;;  %s1474_s16 = sadd.s32 4294967294, %s1955_s14  }
   0xc   : > { %2418 = sst [smem:[#allocation12_spill]] %s1947_s12  ;;  %s34_s17 = sadd.s32 1, %s1947_s12 }
   0xd   : > { %2419 = sst [smem:[#allocation13_spill]] %s1951_s13  ;;  %s37_s18 = sadd.s32 1, %s1951_s13 }
   0xe   : > { %p35_p0 = scmp.ge.s32.totalorder %s34_s17, 2  ;;  %s46_s19 = sadd.s32 1, %s1935_s9 }
   0xf   : > { %p53_p1 = scmp.ne.s32.totalorder %s1935_s9, %s1931_s30  ;;  %p54_p2 = scmp.eq.s32.totalorder %s1955_s14, 0 }
  0x10   : > { %s2442_s17 = smov (%p35_p0, %s34_s17), 0  ;;  %s2444_s18 = smov (!%p35_p0, %s37_s18), %s1951_s13 }
  0x11   : > { %2420 = sst [smem:[#allocation14_spill]] %s2442_s17  ;;  %s42_s20 = ssub.s32 %s1947_s12, %s2442_s17 }
  0x12   : > { %p2070_p3 = por %p54_p2, %p53_p1  ;;  %p39_p4 = scmp.ge.s32.totalorder %s2444_s18, 2 }
  0x13   : > { %s208_s22 = sadd.s32 1, %s1927_s29  ;;  %p218_p5 = scmp.ne.s32.totalorder %s1927_s29, %s1923_s28 }
  0x14   : > { %p219_p6 = scmp.eq.s32.totalorder %s1473_s15, 3  ;;  %s2446_s18 = smov (%p39_p4, %s2444_s18), 0 }
  0x15   : > { %2422 = sst [smem:[#allocation15_spill]] %s2446_s18  ;;  %p224_p8 = scmp.ne.s32.totalorder %s1923_s28, %s1919_s27 }
  0x16   : > { %p2079_p7 = por %p219_p6, %p218_p5  ;;  %s41_s24 = ssub.s32 %s1951_s13, %s2446_s18 }
  0x17   : > { %p225_p9 = scmp.eq.s32.totalorder %s1474_s16, 3  ;;  %s43_s25 = sor.u32 %s42_s20, %s41_s24 }
  0x18   : > { %p206_p10 = scmp.eq.s32.totalorder %s41_s24, 0  ;;  %p44_p11 = scmp.eq.s32.totalorder %s43_s25, 0 }
  0x19   : > { %p2087_p12 = por %p225_p9, %p224_p8  ;;  %p1476_p13 = scmp.ge.s32.totalorder %s1955_s14, 4 }
  0x1a   : > { %s2092_s17 = scalar_select %p206_p10, %s1927_s29, %s208_s22  }
  0x1b   : > { %s2424_s26 = scalar_select %p2087_p12, 1, 0 }
  0x1c   : > { %2426 = sst [smem:[#allocation17_spill]] %s2092_s17  ;;  %279 = sbr.rel (%p1476_p13) target bundleno = 55 (0x37), region = 32 }
  0x1d   : > { %2425 = sst [smem:[#allocation16_spill]] %s2424_s26 }
  0x1e   : > { %s2095_s15 = scalar_select %p44_p11, %s1935_s9, %s46_s19  }
  0x20   : > { %2427 = sst [smem:[#allocation18_spill]] %s2095_s15 }
  0x23   : > { %282 = sbr.rel (!%p2070_p3) target bundleno = 55 (0x37), region = 36  ;;  %s284_s16 = sand.u32 (%p2070_p3), 1, %s1935_s9  }
  0x24   : > { %s1548_s20 = sshll.u32 (%p2070_p3), %s1951_s13, 5  ;;  %s1477_s24 = sshll.u32 (%p2070_p3), %s284_s16, 6 }
  0x25   : > { %s289_s25 = sadd.s32 (%p2070_p3), %s1947_s12, %s1548_s20  ;;  %s2428_s0 = sld [smem:[#allocation19_spill]] (%p2070_p3) }
  0x26   : > { %s1480_s18 = sshll.u32 (%p2070_p3), %s289_s25, 2  ;;  %s286_s19 = scalar_lea.vmem (%p2070_p3), [#allocation3], %s1477_s24 }
  0x2b   : > { %s2106_s22 = scalar_lea.vmem %s2428_s0, %s1480_s18 }
  0x2c   : > { %v307_v0 = vld [vmem:[%s2106_s22] sm:$0xf]  ;;  %v309_v1 = vld [vmem:[%s2106_s22 + $0x8] sm:$0xf]  ;;  %v311_v2 = vld [vmem:[%s2106_s22 + $0x10] sm:$0xf] }
  0x2d   : > { %308 = vst [vmem:[%s286_s19] sm:$0xf] %v307_v0  ;;  %310 = vst [vmem:[%s286_s19 + $0x4] sm:$0xf] %v309_v1  ;;  %v313_v3 = vld [vmem:[%s2106_s22 + $0x18] sm:$0xf] }
  0x2e   : > { %312 = vst [vmem:[%s286_s19 + $0x8] sm:$0xf] %v311_v2  ;;  %v315_v4 = vld [vmem:[%s2106_s22 + $0x20] sm:$0xf]  ;;  %v317_v5 = vld [vmem:[%s2106_s22 + $0x28] sm:$0xf] }
  0x2f   : > { %314 = vst [vmem:[%s286_s19 + $0xc] sm:$0xf] %v313_v3  ;;  %316 = vst [vmem:[%s286_s19 + $0x10] sm:$0xf] %v315_v4  ;;  %v319_v6 = vld [vmem:[%s2106_s22 + $0x30] sm:$0xf] }
  0x30   : > { %318 = vst [vmem:[%s286_s19 + $0x14] sm:$0xf] %v317_v5  ;;  %v321_v7 = vld [vmem:[%s2106_s22 + $0x38] sm:$0xf]  ;;  %v323_v8 = vld [vmem:[%s2106_s22 + $0x40] sm:$0xf] }
  0x31   : > { %320 = vst [vmem:[%s286_s19 + $0x18] sm:$0xf] %v319_v6  ;;  %322 = vst [vmem:[%s286_s19 + $0x1c] sm:$0xf] %v321_v7  ;;  %v325_v9 = vld [vmem:[%s2106_s22 + $0x48] sm:$0xf] }
  0x32   : > { %324 = vst [vmem:[%s286_s19 + $0x20] sm:$0xf] %v323_v8  ;;  %v327_v10 = vld [vmem:[%s2106_s22 + $0x50] sm:$0xf]  ;;  %v329_v11 = vld [vmem:[%s2106_s22 + $0x58] sm:$0xf] }
  0x33   : > { %326 = vst [vmem:[%s286_s19 + $0x24] sm:$0xf] %v325_v9  ;;  %328 = vst [vmem:[%s286_s19 + $0x28] sm:$0xf] %v327_v10  ;;  %v331_v12 = vld [vmem:[%s2106_s22 + $0x60] sm:$0xf] }
  0x34   : > { %330 = vst [vmem:[%s286_s19 + $0x2c] sm:$0xf] %v329_v11  ;;  %v333_v13 = vld [vmem:[%s2106_s22 + $0x68] sm:$0xf]  ;;  %v335_v14 = vld [vmem:[%s2106_s22 + $0x70] sm:$0xf] }
  0x35   : > { %332 = vst [vmem:[%s286_s19 + $0x30] sm:$0xf] %v331_v12  ;;  %334 = vst [vmem:[%s286_s19 + $0x34] sm:$0xf] %v333_v13  ;;  %v337_v15 = vld [vmem:[%s2106_s22 + $0x78] sm:$0xf] }
  0x36   : > { %336 = vst [vmem:[%s286_s19 + $0x38] sm:$0xf] %v335_v14  ;;  %338 = vst [vmem:[%s286_s19 + $0x3c] sm:$0xf] %v337_v15 }
  0x37 PF: > { %p1481_p0 = scmp.ge.s32.totalorder %s1955_s14, 1  ;;  %p410_p1 = scmp.lt.s32.totalorder %s1955_s14, 5 }
  0x39   : > { %p411_p2 = pnand %p1481_p0, %p410_p1 }
  0x3a   : > { %s417_s27 = sand.u32 (!%p411_p2), 1, %s1931_s30   ;;  %s2128_s18 = sand.u32 (!%p411_p2), 1, %s1923_s28  }
  0x3b   : > { %414 = sbr.rel (%p411_p2) target bundleno = 653 (0x28d), region = 85  ;;  %s1482_s21 = sshll.u32 (!%p411_p2), %s417_s27, 6 }
  0x3c   : > { %s1483_s26 = sshll.u32 (!%p411_p2), %s2128_s18, 7  ;;  %s1484_s16 = sshll.u32 (!%p411_p2), %s2128_s18, 1 }
  0x3d   : > { %s1485_s20 = sshll.u32 (!%p411_p2), %s1939_s10, 4  ;;  %s1487_s24 = sshll.u32 (!%p411_p2), %s1943_s11, 4 }
  0x3e   : > { %p467_p3 = scmp.lt.s32.totalorder (!%p411_p2), %s1485_s20, 31  ;;  %p473_p4 = scmp.lt.s32.totalorder (!%p411_p2), %s1487_s24, 31 }
  0x3f   : > { %s2144_s27 = scalar_lea.vmem (!%p411_p2), [#allocation3], %s1482_s21  ;;  %s2146_s9 = scalar_lea.vmem (!%p411_p2), [#allocation4], %s1483_s26 }
  0x40   : > { %s2148_s17 = scalar_lea.vmem (!%p411_p2), [#allocation6], %s1484_s16  ;;  %p1489_p5 = scmp.ne.s32.totalorder (!%p411_p2), %s1939_s10, 0 }
  0x42   : > { %s2448_s20 = smov (!%p467_p3, %s1485_s20), 31  ;;  %s2450_s24 = smov (!%p473_p4, %s1487_s24), 31 }
  0x43   : > { %s1486_s25 = sshll.u32 %s2448_s20, 2  ;;  %s1488_s30 = sshll.u32 %s2450_s24, 2  ;;  %vm484_vm0 = vcmask (!%p1489_p5), 523264   ;;  %v1957_v16 = vmov (!%p1489_p5), 0.0  }
  0x44   : > { %s2137_s0 = scalar_lea.vmem %s2400_s1, %s1486_s25  ;;  %s2142_s15 = scalar_lea.vmem %s2401_s2, %s1488_s30  ;;  %485 = vst.msk [vmem:[#allocation2] sm:$0xff] (!%p1489_p5), %vm484_vm0, %v1957_v16  ;;  %486 = vst.msk [vmem:[#allocation2 + $0x8] sm:$0xff] (!%p1489_p5), %vm484_vm0, %v1957_v16 }
  0x45   : > { %483 = sbr.rel (%p1489_p5) target bundleno = 76 (0x4c), region = 93  ;;  %487 = vst.msk [vmem:[#allocation2 + $0x10] sm:$0xff] (!%p1489_p5), %vm484_vm0, %v1957_v16  ;;  %488 = vst.msk [vmem:[#allocation2 + $0x18] sm:$0xff] (!%p1489_p5), %vm484_vm0, %v1957_v16 }
  0x46   : > { %489 = vst.msk [vmem:[#allocation2 + $0x20] sm:$0xff] (!%p1489_p5), %vm484_vm0, %v1957_v16  ;;  %490 = vst.msk [vmem:[#allocation2 + $0x28] sm:$0xff] (!%p1489_p5), %vm484_vm0, %v1957_v16 }
  0x47   : > { %491 = vst.msk [vmem:[#allocation2 + $0x30] sm:$0xff] (!%p1489_p5), %vm484_vm0, %v1957_v16  ;;  %492 = vst.msk [vmem:[#allocation2 + $0x38] sm:$0xff] (!%p1489_p5), %vm484_vm0, %v1957_v16 }
  0x48   : > { %493 = vst.msk [vmem:[#allocation2 + $0x40] sm:$0xff] (!%p1489_p5), %vm484_vm0, %v1957_v16  ;;  %494 = vst.msk [vmem:[#allocation2 + $0x48] sm:$0xff] (!%p1489_p5), %vm484_vm0, %v1957_v16 }
  0x49   : > { %495 = vst.msk [vmem:[#allocation2 + $0x50] sm:$0xff] (!%p1489_p5), %vm484_vm0, %v1957_v16  ;;  %496 = vst.msk [vmem:[#allocation2 + $0x58] sm:$0xff] (!%p1489_p5), %vm484_vm0, %v1957_v16 }
  0x4a   : > { %497 = vst.msk [vmem:[#allocation2 + $0x60] sm:$0xff] (!%p1489_p5), %vm484_vm0, %v1957_v16  ;;  %498 = vst.msk [vmem:[#allocation2 + $0x68] sm:$0xff] (!%p1489_p5), %vm484_vm0, %v1957_v16 }
  0x4b   : > { %499 = vst.msk [vmem:[#allocation2 + $0x70] sm:$0xff] (!%p1489_p5), %vm484_vm0, %v1957_v16  ;;  %500 = vst.msk [vmem:[#allocation2 + $0x78] sm:$0xff] (!%p1489_p5), %vm484_vm0, %v1957_v16 }
  0x4c PF: > { %v1781_v17 = vld [vmem:[%s2137_s0] sm:$0xff]   ;;  %v1782_v18 = vld [vmem:[%s2137_s0 + $0x8] sm:$0xff]   ;;  %v1783_v19 = vld [vmem:[%s2137_s0 + $0x10] sm:$0xff]   ;;  %vm758_vm1 = vcmask 523264   ;;  %p1506_p6 = scmp.ne.s32.totalorder %s1939_s10, 1 }
  0x4d   : > { %1590 = vmatprep.subr.bf16.mxu0 %v1781_v17  ;;  %1670 = vmatprep.subr.bf16.mxu1 %v1781_v17  ;;  %v1784_v20 = vld [vmem:[%s2137_s0 + $0x18] sm:$0xff]   ;;  %v1789_v21 = vld [vmem:[%s2144_s27] sm:$0xff]   ;;  %v1786_v24 = vld [vmem:[%s2137_s0 + $0x28] sm:$0xff]   ;;  %vm1301_vm2 = vcmask (!%p1506_p6), 1040384  }
  0x4e   : > { %1591 = vmatpush3.bf16.msra.mxu0 %v1781_v17  ;;  %1678 = vmatpush3.bf16.msra.mxu1 %v1781_v17  ;;  %v1790_v22 = vld [vmem:[%s2144_s27 + $0x20] sm:$0xff]   ;;  %v1787_v25 = vld [vmem:[%s2137_s0 + $0x30] sm:$0xff]   ;;  %v1788_v26 = vld [vmem:[%s2137_s0 + $0x38] sm:$0xff]  }
  0x4f   : > { %1592 = vmatprep.subr.bf16.mxu0 %v1782_v18  ;;  %1671 = vmatprep.subr.bf16.mxu1 %v1782_v18  ;;  %v1785_v23 = vld [vmem:[%s2137_s0 + $0x20] sm:$0xff]   ;;  %v1791_v27 = vld [vmem:[%s2144_s27 + $0x8] sm:$0xff]   ;;  %v1793_v29 = vld [vmem:[%s2144_s27 + $0x10] sm:$0xff]  }
  0x50   : > { %1606 = vmatprep.mubr.bf16.mxu0 %v1789_v21  ;;  %1614 = vmatprep.mubr.bf16.mxu1 %v1790_v22  ;;  %v1792_v28 = vld [vmem:[%s2144_s27 + $0x28] sm:$0xff]   ;;  %v1794_v30 = vld [vmem:[%s2144_s27 + $0x30] sm:$0xff]   ;;  %v1795_v31 = vld [vmem:[%s2144_s27 + $0x18] sm:$0xff]  }
  0x51   : > { %v1796_v32 = vld [vmem:[%s2144_s27 + $0x38] sm:$0xff]   ;;  %v503_v33 = vld [vmem:[#allocation2 + $0x10] sm:$0xff]  ;;  %v501_v35 = vld [vmem:[#allocation2] sm:$0xff] }
  0x52   : > { %1593 = vmatpush3.bf16.msra.mxu0 %v1782_v18  ;;  %1679 = vmatpush3.bf16.msra.mxu1 %v1782_v18  ;;  %v511_v34 = vld [vmem:[#allocation2 + $0x50] sm:$0xff]  ;;  %v509_v36 = vld [vmem:[#allocation2 + $0x40] sm:$0xff]  ;;  %v504_v39 = vld [vmem:[#allocation2 + $0x18] sm:$0xff] }
  0x53   : > { %1594 = vmatprep.subr.bf16.mxu0 %v1783_v19  ;;  %1672 = vmatprep.subr.bf16.mxu1 %v1783_v19  ;;  %v512_v40 = vld [vmem:[#allocation2 + $0x58] sm:$0xff]  ;;  %v502_v45 = vld [vmem:[#allocation2 + $0x8] sm:$0xff]  ;;  %v507_v57 = vld [vmem:[#allocation2 + $0x30] sm:$0xff] }
  0x54   : > { %v510_v46 = vld [vmem:[#allocation2 + $0x48] sm:$0xff]  ;;  %v515_v58 = vld [vmem:[#allocation2 + $0x70] sm:$0xff]  ;;  %v505_v59 = vld [vmem:[#allocation2 + $0x20] sm:$0xff] }
  0x55   : > { %v513_v60 = vld [vmem:[#allocation2 + $0x60] sm:$0xff]  ;;  %v508_v63 = vld [vmem:[#allocation2 + $0x38] sm:$0xff]  ;;  %v506_v5 = vld [vmem:[#allocation2 + $0x28] sm:$0xff] }
  0x56   : > { %1595 = vmatpush3.bf16.msra.mxu0 %v1783_v19  ;;  %1680 = vmatpush3.bf16.msra.mxu1 %v1783_v19  ;;  %v516_v0 = vld [vmem:[#allocation2 + $0x78] sm:$0xff]  ;;  %v514_v6 = vld [vmem:[#allocation2 + $0x68] sm:$0xff]  ;;  %v1797_v17 = vld [vmem:[%s2402_s3] sm:$0xff] (!%p1506_p6)  }
  0x57   : > { %1596 = vmatprep.subr.bf16.mxu0 %v1784_v20  ;;  %1673 = vmatprep.subr.bf16.mxu1 %v1784_v20  ;;  %v1798_v18 = vld [vmem:[%s2404_s5] sm:$0xff] (!%p1506_p6)   ;;  %v1799_v19 = vld [vmem:[%s2402_s3 + $0x8] sm:$0xff] (!%p1506_p6)   ;;  %v1801_v21 = vld [vmem:[%s2402_s3 + $0x10] sm:$0xff] (!%p1506_p6)  }
  0x58   : > { %v1802_v22 = vld [vmem:[%s2404_s5 + $0x10] sm:$0xff] (!%p1506_p6)  }
  0x5a   : > { %1597 = vmatpush3.bf16.msra.mxu0 %v1784_v20  ;;  %1681 = vmatpush3.bf16.msra.mxu1 %v1784_v20  ;;  %v1800_v20 = vld [vmem:[%s2404_s5 + $0x8] sm:$0xff] (!%p1506_p6)  }
  0x5b   : > { %1598 = vmatprep.subr.bf16.mxu0 %v1785_v23  ;;  %1674 = vmatprep.subr.bf16.mxu1 %v1785_v23 }
  0x5e   : > { %1599 = vmatpush3.bf16.msra.mxu0 %v1785_v23  ;;  %1682 = vmatpush3.bf16.msra.mxu1 %v1785_v23  ;;  %v1803_v23 = vld [vmem:[%s2402_s3 + $0x18] sm:$0xff] (!%p1506_p6)  }
  0x5f   : > { %1600 = vmatprep.subr.bf16.mxu0 %v1786_v24  ;;  %1675 = vmatprep.subr.bf16.mxu1 %v1786_v24 }
  0x62   : > { %1601 = vmatpush3.bf16.msra.mxu0 %v1786_v24  ;;  %1683 = vmatpush3.bf16.msra.mxu1 %v1786_v24 }
  0x63   : > { %1602 = vmatprep.subr.bf16.mxu0 %v1787_v25  ;;  %1676 = vmatprep.subr.bf16.mxu1 %v1787_v25 }
  0x66   : > { %1603 = vmatpush3.bf16.msra.mxu0 %v1787_v25  ;;  %1684 = vmatpush3.bf16.msra.mxu1 %v1787_v25 }
  0x67   : > { %1604 = vmatprep.subr.bf16.mxu0 %v1788_v26  ;;  %1677 = vmatprep.subr.bf16.mxu1 %v1788_v26 }
  0x6a   : > { %1605 = vmatpush3.bf16.msra.mxu0 %v1788_v26  ;;  %1685 = vmatpush3.bf16.msra.mxu1 %v1788_v26  ;;  %v1804_v26 = vld [vmem:[%s2404_s5 + $0x18] sm:$0xff] (!%p1506_p6)  }
  0x6b   : > { %1622 = vmatprep.subr.bf16.mxu0 (!%p1506_p6), %v1797_v17  ;;  %1646 = vmatprep.subr.bf16.mxu1 (!%p1506_p6), %v1798_v18 }
  0x6d   : > { %1607 = vmatmul.mubr.bf16.vlgmr.msra.gmra.mrb[0].mxu0 %v1791_v27  ;;  %1615 = vmatmul.mubr.bf16.vlgmr.msra.gmra.mrb[0].mxu1 %v1792_v28  ;;  %v1805_v28 = vld [vmem:[%s2142_s15] sm:$0xff] (!%p1506_p6)  }
  0x6e   : > { %1610 = vmatprep.mubr.bf16.mxu0 %v1793_v29  ;;  %1618 = vmatprep.mubr.bf16.mxu1 %v1794_v30 }
  0x6f   : > { %1623 = vmatpush3.bf16.msra.mxu0 (!%p1506_p6), %v1797_v17  ;;  %1647 = vmatpush3.bf16.msra.mxu1 (!%p1506_p6), %v1798_v18 }
  0x70   : > { %1624 = vmatprep.subr.bf16.mxu0 (!%p1506_p6), %v1799_v19  ;;  %1648 = vmatprep.subr.bf16.mxu1 (!%p1506_p6), %v1800_v20 }
  0x73   : > { %1625 = vmatpush3.bf16.msra.mxu0 (!%p1506_p6), %v1799_v19  ;;  %1649 = vmatpush3.bf16.msra.mxu1 (!%p1506_p6), %v1800_v20 }
  0x74   : > { %1626 = vmatprep.subr.bf16.mxu0 (!%p1506_p6), %v1801_v21  ;;  %1650 = vmatprep.subr.bf16.mxu1 (!%p1506_p6), %v1802_v22 }
  0x75   : > { %1611 = vmatmul.mubr.bf16.gmra.mrb[4].mxu0 %v1795_v31  ;;  %1619 = vmatmul.mubr.bf16.gmra.mrb[4].mxu1 %v1796_v32 }
  0x76   : > { %1654 = vmatprep.mubr.msk.bf16.mxu1 (!%p1506_p6), %vm758_vm1, %v1805_v28 }
  0x77   : > { %1627 = vmatpush3.bf16.msra.mxu0 (!%p1506_p6), %v1801_v21  ;;  %1651 = vmatpush3.bf16.msra.mxu1 (!%p1506_p6), %v1802_v22 }
  0x78   : > { %1628 = vmatprep.subr.bf16.mxu0 (!%p1506_p6), %v1803_v23  ;;  %1652 = vmatprep.subr.bf16.mxu1 (!%p1506_p6), %v1804_v26 }
  0x7b   : > { %1629 = vmatpush3.bf16.msra.mxu0 (!%p1506_p6), %v1803_v23  ;;  %1653 = vmatpush3.bf16.msra.mxu1 (!%p1506_p6), %v1804_v26 }
 0x140   : > { %v1608_v37 = vpop.f32.mrb[0].mxu0  ;;  %v1616_v38 = vpop.f32.mrb[0].mxu1 }
 0x141   : > { %v744_v41 = vadd.f32 %v1608_v37, %v503_v33  ;;  %v752_v42 = vadd.f32 %v1616_v38, %v511_v34  ;;  %v679_v43 = vpop.f32.mrb[1].mxu0  ;;  %v711_v44 = vpop.f32.mrb[1].mxu1  ;;  %v1806_v34 = vld [vmem:[%s2142_s15 + $0x8] sm:$0xff] (!%p1506_p6)  }
 0x142   : > { %v742_v47 = vadd.f32 %v679_v43, %v501_v35  ;;  %v750_v48 = vadd.f32 %v711_v44, %v509_v36  ;;  %v1609_v49 = vpop.f32.mrb[2].mxu0  ;;  %v1617_v50 = vpop.f32.mrb[2].mxu1  ;;  %v1807_v36 = vld [vmem:[%s2142_s15 + $0x10] sm:$0xff] (!%p1506_p6)   ;;  %v1809_v44 = vld [vmem:[%s2142_s15 + $0x20] sm:$0xff] (!%p1506_p6)  }
 0x143   : > { %761 = vst.msk [vmem:[#allocation2 + $0x10] sm:$0xff] %vm758_vm1, %v744_v41  ;;  %769 = vst.msk [vmem:[#allocation2 + $0x50] sm:$0xff] %vm758_vm1, %v752_v42  ;;  %v745_v51 = vadd.f32 %v1609_v49, %v504_v39  ;;  %v753_v52 = vadd.f32 %v1617_v50, %v512_v40  ;;  %v682_v53 = vpop.f32.mrb[3].mxu0  ;;  %v714_v54 = vpop.f32.mrb[3].mxu1  ;;  %1655 = vmatmul.mubr.msk.bf16.vlgmr.msra.gmra.mrb[0].mxu1 (!%p1506_p6), %vm758_vm1, %v1806_v34  ;;  %v1808_v42 = vld [vmem:[%s2142_s15 + $0x18] sm:$0xff] (!%p1506_p6)   ;;  %v1810_v50 = vld [vmem:[%s2142_s15 + $0x28] sm:$0xff] (!%p1506_p6)  }
 0x144   : > { %759 = vst.msk [vmem:[#allocation2] sm:$0xff] %vm758_vm1, %v742_v47  ;;  %767 = vst.msk [vmem:[#allocation2 + $0x40] sm:$0xff] %vm758_vm1, %v750_v48  ;;  %v743_v55 = vadd.f32 %v682_v53, %v502_v45  ;;  %v751_v56 = vadd.f32 %v714_v54, %v510_v46  ;;  %1658 = vmatprep.mubr.msk.bf16.mxu1 (!%p1506_p6), %vm758_vm1, %v1807_v36 }
 0x145   : > { %762 = vst.msk [vmem:[#allocation2 + $0x18] sm:$0xff] %vm758_vm1, %v745_v51  ;;  %770 = vst.msk [vmem:[#allocation2 + $0x58] sm:$0xff] %vm758_vm1, %v753_v52  ;;  %v1811_v52 = vld [vmem:[%s2142_s15 + $0x30] sm:$0xff] (!%p1506_p6)  }
 0x146   : > { %760 = vst.msk [vmem:[#allocation2 + $0x8] sm:$0xff] %vm758_vm1, %v743_v55  ;;  %768 = vst.msk [vmem:[#allocation2 + $0x48] sm:$0xff] %vm758_vm1, %v751_v56  ;;  %v1812_v56 = vld [vmem:[%s2142_s15 + $0x38] sm:$0xff] (!%p1506_p6)  }
 0x148   : > { %v1612_v61 = vpop.f32.mrb[4].mxu0  ;;  %v1620_v62 = vpop.f32.mrb[4].mxu1  ;;  %778 = sbr.rel (%p1506_p6) target bundleno = 604 (0x25c), region = 97 }
 0x149   : > { %v748_v1 = vadd.f32 %v1612_v61, %v507_v57  ;;  %v756_v2 = vadd.f32 %v1620_v62, %v515_v58  ;;  %v695_v3 = vpop.f32.mrb[5].mxu0  ;;  %v727_v4 = vpop.f32.mrb[5].mxu1  ;;  %v2251_v57 = vld [vmem:[%s2403_s4] ss:$0 sm:$0xff] (!%p1506_p6) }
 0x14a   : > { %v746_v7 = vadd.f32 %v695_v3, %v505_v59  ;;  %v754_v8 = vadd.f32 %v727_v4, %v513_v60  ;;  %v1613_v9 = vpop.f32.mrb[6].mxu0  ;;  %v1621_v10 = vpop.f32.mrb[6].mxu1  ;;  %v781_v29 = vld [vmem:[#allocation2 + $0x10] sm:$0xff] (!%p1506_p6)  ;;  %v2256_v58 = vld [vmem:[%s2405_s6] ss:$0 sm:$0xff] (!%p1506_p6) }
 0x14b   : > { %765 = vst.msk [vmem:[#allocation2 + $0x30] sm:$0xff] %vm758_vm1, %v748_v1  ;;  %773 = vst.msk [vmem:[#allocation2 + $0x70] sm:$0xff] %vm758_vm1, %v756_v2  ;;  %v749_v11 = vadd.f32 %v1613_v9, %v508_v63  ;;  %v757_v12 = vadd.f32 %v1621_v10, %v516_v0  ;;  %v698_v13 = vpop.f32.mrb[7].mxu0  ;;  %v730_v14 = vpop.f32.mrb[7].mxu1  ;;  %v779_v24 = vld [vmem:[#allocation2] sm:$0xff] (!%p1506_p6)  ;;  %1659 = vmatmul.mubr.msk.bf16.gmra.mrb[4].mxu1 (!%p1506_p6), %vm758_vm1, %v1808_v42  ;;  %v789_v45 = vld [vmem:[#allocation2 + $0x50] sm:$0xff] (!%p1506_p6) }
 0x14c   : > { %763 = vst.msk [vmem:[#allocation2 + $0x20] sm:$0xff] %vm758_vm1, %v746_v7  ;;  %771 = vst.msk [vmem:[#allocation2 + $0x60] sm:$0xff] %vm758_vm1, %v754_v8  ;;  %v747_v15 = vadd.f32 %v698_v13, %v506_v5  ;;  %v755_v16 = vadd.f32 %v730_v14, %v514_v6  ;;  %v782_v30 = vld [vmem:[#allocation2 + $0x18] sm:$0xff] (!%p1506_p6)  ;;  %v787_v39 = vld [vmem:[#allocation2 + $0x40] sm:$0xff] (!%p1506_p6)  ;;  %1662 = vmatprep.mubr.msk.bf16.mxu1 (!%p1506_p6), %vm758_vm1, %v1809_v44 }
 0x14d   : > { %766 = vst.msk [vmem:[#allocation2 + $0x38] sm:$0xff] %vm758_vm1, %v749_v11  ;;  %774 = vst.msk [vmem:[#allocation2 + $0x78] sm:$0xff] %vm758_vm1, %v757_v12  ;;  %v780_v25 = vld [vmem:[#allocation2 + $0x8] sm:$0xff] (!%p1506_p6)  ;;  %v796_v33 = vpack.c.bf16 (!%p1506_p6), %v782_v30, %v781_v29  ;;  %v790_v46 = vld [vmem:[#allocation2 + $0x58] sm:$0xff] (!%p1506_p6) }
 0x14e   : > { %764 = vst.msk [vmem:[#allocation2 + $0x28] sm:$0xff] %vm758_vm1, %v747_v15  ;;  %772 = vst.msk [vmem:[#allocation2 + $0x68] sm:$0xff] %vm758_vm1, %v755_v16  ;;  %v795_v27 = vpack.c.bf16 (!%p1506_p6), %v780_v25, %v779_v24  ;;  %v788_v40 = vld [vmem:[#allocation2 + $0x48] sm:$0xff] (!%p1506_p6)  ;;  %v800_v49 = vpack.c.bf16 (!%p1506_p6), %v790_v46, %v789_v45 }
 0x14f   : > { %v799_v43 = vpack.c.bf16 %v788_v40, %v787_v39 }
 0x150   : > { %1630 = vmatprep.mubr.msk.bf16.mxu0 %vm758_vm1, %v795_v27 }
 0x151   : > { %1631 = vmatmul.mubr.msk.bf16.vlgmr.msra.gmra.mrb[0].mxu0 %vm758_vm1, %v796_v33 }
 0x152   : > { %v785_v37 = vld [vmem:[#allocation2 + $0x30] sm:$0xff] }
 0x153   : > { %v783_v31 = vld [vmem:[#allocation2 + $0x20] sm:$0xff]  ;;  %1663 = vmatmul.mubr.msk.bf16.gmra.mrb[8].mxu1 %vm758_vm1, %v1810_v50  ;;  %v793_v53 = vld [vmem:[#allocation2 + $0x70] sm:$0xff] }
 0x154   : > { %v786_v38 = vld [vmem:[#allocation2 + $0x38] sm:$0xff]  ;;  %v791_v47 = vld [vmem:[#allocation2 + $0x60] sm:$0xff]  ;;  %1666 = vmatprep.mubr.msk.bf16.mxu1 %vm758_vm1, %v1811_v52 }
 0x155   : > { %v784_v32 = vld [vmem:[#allocation2 + $0x28] sm:$0xff]  ;;  %v798_v41 = vpack.c.bf16 %v786_v38, %v785_v37  ;;  %v794_v54 = vld [vmem:[#allocation2 + $0x78] sm:$0xff] }
 0x156   : > { %v797_v35 = vpack.c.bf16 %v784_v32, %v783_v31  ;;  %v792_v48 = vld [vmem:[#allocation2 + $0x68] sm:$0xff]  ;;  %v802_v55 = vpack.c.bf16 %v794_v54, %v793_v53 }
 0x157   : > { %v801_v51 = vpack.c.bf16 %v792_v48, %v791_v47 }
 0x158   : > { %1634 = vmatprep.mubr.msk.bf16.mxu0 %vm758_vm1, %v797_v35 }
 0x159   : > { %1635 = vmatmul.mubr.msk.bf16.gmra.mrb[4].mxu0 %vm758_vm1, %v798_v41 }
 0x15a   : > { %1638 = vmatprep.mubr.msk.bf16.mxu0 %vm758_vm1, %v799_v43 }
 0x15b   : > { %1667 = vmatmul.mubr.msk.bf16.gmra.mrb[12].mxu1 %vm758_vm1, %v1812_v56 }
 0x161   : > { %1639 = vmatmul.mubr.msk.bf16.gmra.mrb[8].mxu0 %vm758_vm1, %v800_v49 }
 0x162   : > { %1642 = vmatprep.mubr.msk.bf16.mxu0 %vm758_vm1, %v801_v51 }
 0x169   : > { %1643 = vmatmul.mubr.msk.bf16.gmra.mrb[12].mxu0 %vm758_vm1, %v802_v55 }
 0x216   : > { %v1656_v61 = vpop.f32.mrb[0].mxu1 }
 0x217   : > { %v1141_v63 = vadd.f32 %v1656_v61, %v2256_v58  ;;  %v1132_v1 = vpop.f32.mrb[1].mxu1 }
 0x218   : > { %v1133_v4 = vadd.f32 %v2256_v58, %v1132_v1  ;;  %v1657_v6 = vpop.f32.mrb[2].mxu1 }
 0x219   : > { %v1197_v8 = vmax.f32 %v1141_v63, 0.0  ;;  %v1144_v10 = vadd.f32 %v1657_v6, %v2256_v58  ;;  %v1135_v12 = vpop.f32.mrb[3].mxu1 }
 0x21a   : > { %v1195_v13 = vmax.f32 %v1133_v4, 0.0  ;;  %v1136_v15 = vadd.f32 %v2256_v58, %v1135_v12 }
 0x21b   : > { %v1198_v17 = vmax.f32 %v1144_v10, 0.0 }
 0x21c   : > { %v1196_v20 = vmax.f32 %v1136_v15, 0.0 }
 0x21e   : > { %v1660_v26 = vpop.f32.mrb[4].mxu1 }
 0x21f   : > { %v1157_v30 = vadd.f32 %v1660_v26, %v2256_v58  ;;  %v1148_v32 = vpop.f32.mrb[5].mxu1 }
 0x220   : > { %v1149_v37 = vadd.f32 %v2256_v58, %v1148_v32  ;;  %v1661_v38 = vpop.f32.mrb[6].mxu1 }
 0x221   : > { %v1201_v40 = vmax.f32 %v1157_v30, 0.0  ;;  %v1160_v43 = vadd.f32 %v1661_v38, %v2256_v58  ;;  %v1151_v44 = vpop.f32.mrb[7].mxu1 }
 0x222   : > { %v1199_v47 = vmax.f32 %v1149_v37, 0.0  ;;  %v1152_v52 = vadd.f32 %v2256_v58, %v1151_v44 }
 0x223   : > { %v1202_v51 = vmax.f32 %v1160_v43, 0.0 }
 0x224   : > { %v1632_v59 = vpop.f32.mrb[0].mxu0 }
 0x225   : > { %v909_v60 = vadd.f32 %v1632_v59, %v2251_v57  ;;  %v900_v62 = vpop.f32.mrb[1].mxu0 }
 0x226   : > { %v901_v0 = vadd.f32 %v2251_v57, %v900_v62  ;;  %v1633_v2 = vpop.f32.mrb[2].mxu0 }
 0x227   : > { %v965_v3 = vmax.f32 %v909_v60, 0.0  ;;  %v912_v5 = vadd.f32 %v1633_v2, %v2251_v57  ;;  %v903_v7 = vpop.f32.mrb[3].mxu0  ;;  %v1200_v60 = vmax.f32 %v1152_v52, 0.0  ;;  %v1664_v2 = vpop.f32.mrb[8].mxu1 }
 0x228   : > { %v963_v9 = vmax.f32 %v901_v0, 0.0  ;;  %v904_v11 = vadd.f32 %v2251_v57, %v903_v7  ;;  %v1173_v6 = vadd.f32 %v1664_v2, %v2256_v58 }
 0x229   : > { %v966_v14 = vmax.f32 %v912_v5, 0.0  ;;  %v1213_v16 = vadd.f32 %v1197_v8, %v965_v3  ;;  %v1164_v8 = vpop.f32.mrb[9].mxu1 }
 0x22a   : > { %v964_v18 = vmax.f32 %v904_v11, 0.0  ;;  %v1211_v19 = vadd.f32 %v1195_v13, %v963_v9  ;;  %v1165_v12 = vadd.f32 %v2256_v58, %v1164_v8 }
 0x22b   : > { %1229 = vst [vmem:[%s2146_s9 + $0x10] sm:$0xff] %v1213_v16  ;;  %v1214_v21 = vadd.f32 %v1198_v17, %v966_v14  ;;  %v1266_v23 = vmul.f32 %v1213_v16, %v1213_v16  ;;  %v1665_v14 = vpop.f32.mrb[10].mxu1 }
 0x22c   : > { %v1636_v22 = vpop.f32.mrb[4].mxu0  ;;  %1227 = vst [vmem:[%s2146_s9] sm:$0xff] %v1211_v19  ;;  %v1212_v24 = vadd.f32 %v1196_v20, %v964_v18  ;;  %v1264_v28 = vmul.f32 %v1211_v19, %v1211_v19  ;;  %v1205_v18 = vmax.f32 %v1173_v6, 0.0  ;;  %v1167_v20 = vpop.f32.mrb[11].mxu1 }
 0x22d   : > { %v925_v25 = vadd.f32 %v1636_v22, %v2251_v57  ;;  %v916_v27 = vpop.f32.mrb[5].mxu0  ;;  %1230 = vst [vmem:[%s2146_s9 + $0x18] sm:$0xff] %v1214_v21  ;;  %v1267_v29 = vmul.f32 %v1214_v21, %v1214_v21 }
 0x22e   : > { %v917_v31 = vadd.f32 %v2251_v57, %v916_v27  ;;  %v1637_v33 = vpop.f32.mrb[6].mxu0  ;;  %1228 = vst [vmem:[%s2146_s9 + $0x8] sm:$0xff] %v1212_v24  ;;  %v1243_v34 = vadd.f32 %v1212_v24, %v1211_v19  ;;  %v1265_v35 = vmul.f32 %v1212_v24, %v1212_v24 }
 0x22f   : > { %v969_v36 = vmax.f32 %v925_v25, 0.0  ;;  %v919_v39 = vpop.f32.mrb[7].mxu0  ;;  %v928_v42 = vadd.f32 %v1637_v33, %v2251_v57 }
 0x230   : > { %v967_v41 = vmax.f32 %v917_v31, 0.0  ;;  %v1244_v45 = vadd.f32 %v1243_v34, %v1213_v16  ;;  %v1280_v46 = vadd.f32 %v1265_v35, %v1264_v28  ;;  %v920_v48 = vadd.f32 %v2251_v57, %v919_v39 }
 0x231   : > { %v1217_v49 = vadd.f32 %v1201_v40, %v969_v36  ;;  %v970_v50 = vmax.f32 %v928_v42, 0.0  ;;  %v1168_v28 = vadd.f32 %v2256_v58, %v1167_v20  ;;  %v1668_v40 = vpop.f32.mrb[12].mxu1 }
 0x232   : > { %v1281_v53 = vadd.f32 %v1280_v46, %v1266_v23  ;;  %v1215_v54 = vadd.f32 %v1199_v47, %v967_v41  ;;  %v1245_v55 = vadd.f32 %v1244_v45, %v1214_v21  ;;  %v968_v56 = vmax.f32 %v920_v48, 0.0  ;;  %v1180_v46 = vpop.f32.mrb[13].mxu1 }
 0x233   : > { %1233 = vst [vmem:[%s2146_s9 + $0x30] sm:$0xff] %v1217_v49  ;;  %v1218_v59 = vadd.f32 %v1202_v51, %v970_v50  ;;  %v1270_v4 = vmul.f32 %v1217_v49, %v1217_v49  ;;  %v1203_v21 = vmax.f32 %v1165_v12, 0.0  ;;  %v1176_v23 = vadd.f32 %v1665_v14, %v2256_v58  ;;  %v1669_v52 = vpop.f32.mrb[14].mxu1 }
 0x234   : > { %v1640_v61 = vpop.f32.mrb[8].mxu0  ;;  %1231 = vst [vmem:[%s2146_s9 + $0x20] sm:$0xff] %v1215_v54  ;;  %v1246_v62 = vadd.f32 %v1245_v55, %v1215_v54  ;;  %v1268_v63 = vmul.f32 %v1215_v54, %v1215_v54  ;;  %v1282_v0 = vadd.f32 %v1281_v53, %v1267_v29  ;;  %v1216_v5 = vadd.f32 %v1200_v60, %v968_v56  ;;  %v1183_v60 = vpop.f32.mrb[15].mxu1 }
 0x235   : > { %v941_v1 = vadd.f32 %v1640_v61, %v2251_v57  ;;  %v932_v3 = vpop.f32.mrb[9].mxu0  ;;  %1234 = vst [vmem:[%s2146_s9 + $0x38] sm:$0xff] %v1218_v59  ;;  %v1206_v30 = vmax.f32 %v1176_v23, 0.0  ;;  %v1271_v32 = vmul.f32 %v1218_v59, %v1218_v59  ;;  %v1204_v35 = vmax.f32 %v1168_v28, 0.0 }
 0x236   : > { %v933_v7 = vadd.f32 %v2251_v57, %v932_v3  ;;  %v1641_v9 = vpop.f32.mrb[10].mxu0  ;;  %v1283_v10 = vadd.f32 %v1282_v0, %v1268_v63  ;;  %1232 = vst [vmem:[%s2146_s9 + $0x28] sm:$0xff] %v1216_v5  ;;  %v1247_v16 = vadd.f32 %v1246_v62, %v1216_v5  ;;  %v1269_v17 = vmul.f32 %v1216_v5, %v1216_v5 }
 0x237   : > { %v973_v11 = vmax.f32 %v941_v1, 0.0  ;;  %v944_v13 = vadd.f32 %v1641_v9, %v2251_v57  ;;  %v935_v15 = vpop.f32.mrb[11].mxu0  ;;  %v1189_v45 = vadd.f32 %v1668_v40, %v2256_v58  ;;  %v1181_v51 = vadd.f32 %v2256_v58, %v1180_v46 }
 0x238   : > { %v971_v19 = vmax.f32 %v933_v7, 0.0  ;;  %v936_v24 = vadd.f32 %v2251_v57, %v935_v15  ;;  %v1248_v25 = vadd.f32 %v1247_v16, %v1217_v49  ;;  %v1284_v26 = vadd.f32 %v1283_v10, %v1269_v17 }
 0x239   : > { %v974_v22 = vmax.f32 %v944_v13, 0.0  ;;  %v1221_v27 = vadd.f32 %v1205_v18, %v973_v11  ;;  %v1207_v62 = vmax.f32 %v1181_v51, 0.0  ;;  %v1192_v0 = vadd.f32 %v1669_v52, %v2256_v58 }
 0x23a   : > { %v1219_v29 = vadd.f32 %v1203_v21, %v971_v19  ;;  %v972_v31 = vmax.f32 %v936_v24, 0.0  ;;  %v1285_v33 = vadd.f32 %v1284_v26, %v1270_v4  ;;  %v1249_v34 = vadd.f32 %v1248_v25, %v1218_v59 }
 0x23b   : > { %1237 = vst [vmem:[%s2146_s9 + $0x50] sm:$0xff] %v1221_v27  ;;  %v1222_v38 = vadd.f32 %v1206_v30, %v974_v22  ;;  %v1274_v48 = vmul.f32 %v1221_v27, %v1221_v27  ;;  %v1209_v59 = vmax.f32 %v1189_v45, 0.0  ;;  %v1210_v7 = vmax.f32 %v1192_v0, 0.0 }
 0x23c   : > { %v1644_v36 = vpop.f32.mrb[12].mxu0  ;;  %1235 = vst [vmem:[%s2146_s9 + $0x40] sm:$0xff] %v1219_v29  ;;  %v1272_v37 = vmul.f32 %v1219_v29, %v1219_v29  ;;  %v1250_v42 = vadd.f32 %v1249_v34, %v1219_v29  ;;  %v1286_v43 = vadd.f32 %v1285_v33, %v1271_v32  ;;  %v1220_v44 = vadd.f32 %v1204_v35, %v972_v31 }
 0x23d   : > { %v957_v39 = vadd.f32 %v1644_v36, %v2251_v57  ;;  %v948_v41 = vpop.f32.mrb[13].mxu0  ;;  %1238 = vst [vmem:[%s2146_s9 + $0x58] sm:$0xff] %v1222_v38  ;;  %v1184_v8 = vadd.f32 %v2256_v58, %v1183_v60  ;;  %v1275_v9 = vmul.f32 %v1222_v38, %v1222_v38 }
 0x23e   : > { %v1645_v47 = vpop.f32.mrb[14].mxu0  ;;  %v949_v50 = vadd.f32 %v2251_v57, %v948_v41  ;;  %v1287_v54 = vadd.f32 %v1286_v43, %v1272_v37  ;;  %1236 = vst [vmem:[%s2146_s9 + $0x48] sm:$0xff] %v1220_v44  ;;  %v1251_v55 = vadd.f32 %v1250_v42, %v1220_v44  ;;  %v1273_v56 = vmul.f32 %v1220_v44, %v1220_v44 }
 0x23f   : > { %v977_v49 = vmax.f32 %v957_v39, 0.0  ;;  %v951_v53 = vpop.f32.mrb[15].mxu0  ;;  %v960_v63 = vadd.f32 %v1645_v47, %v2251_v57  ;;  %v1208_v15 = vmax.f32 %v1184_v8, 0.0 }
 0x240   : > { %v975_v61 = vmax.f32 %v949_v50, 0.0  ;;  %v1252_v1 = vadd.f32 %v1251_v55, %v1221_v27  ;;  %v1288_v2 = vadd.f32 %v1287_v54, %v1273_v56  ;;  %v952_v4 = vadd.f32 %v2251_v57, %v951_v53 }
 0x241   : > { %v1225_v3 = vadd.f32 %v1209_v59, %v977_v49  ;;  %v978_v6 = vmax.f32 %v960_v63, 0.0 }
 0x242   : > { %v1223_v5 = vadd.f32 %v1207_v62, %v975_v61  ;;  %v1289_v10 = vadd.f32 %v1288_v2, %v1274_v48  ;;  %v1253_v11 = vadd.f32 %v1252_v1, %v1222_v38  ;;  %v976_v12 = vmax.f32 %v952_v4, 0.0 }
 0x243   : > { %1241 = vst [vmem:[%s2146_s9 + $0x70] sm:$0xff] %v1225_v3  ;;  %v1226_v14 = vadd.f32 %v1210_v7, %v978_v6  ;;  %v1278_v21 = vmul.f32 %v1225_v3, %v1225_v3 }
 0x244   : > { %1239 = vst [vmem:[%s2146_s9 + $0x60] sm:$0xff] %v1223_v5  ;;  %v1276_v13 = vmul.f32 %v1223_v5, %v1223_v5  ;;  %v1254_v16 = vadd.f32 %v1253_v11, %v1223_v5  ;;  %v1290_v17 = vadd.f32 %v1289_v10, %v1275_v9  ;;  %v1224_v57 = vadd.f32 %v1208_v15, %v976_v12 }
 0x245   : > { %1242 = vst [vmem:[%s2146_s9 + $0x78] sm:$0xff] %v1226_v14  ;;  %v1279_v23 = vmul.f32 %v1226_v14, %v1226_v14 }
 0x246   : > { %v1291_v18 = vadd.f32 %v1290_v17, %v1276_v13  ;;  %1240 = vst [vmem:[%s2146_s9 + $0x68] sm:$0xff] %v1224_v57  ;;  %v1255_v19 = vadd.f32 %v1254_v16, %v1224_v57  ;;  %v1277_v20 = vmul.f32 %v1224_v57, %v1224_v57 }
 0x248   : > { %v1256_v22 = vadd.f32 %v1255_v19, %v1225_v3  ;;  %v1292_v58 = vadd.f32 %v1291_v18, %v1277_v20 }
 0x24a   : > { %v1257_v24 = vadd.f32 %v1256_v22, %v1226_v14  ;;  %v1293_v25 = vadd.f32 %v1292_v58, %v1278_v21 }
 0x24c   : > { %v1258_v26 = vrot.slane %v1257_v24, 4  ;;  %v1294_v27 = vadd.f32 %v1293_v25, %v1279_v23 }
 0x24e   : > { %v1259_v28 = vadd.f32 %v1258_v26, %v1257_v24  ;;  %v1295_v29 = vrot.slane %v1294_v27, 4 }
 0x250   : > { %v1260_v30 = vrot.slane %v1259_v28, 2  ;;  %v1296_v31 = vadd.f32 %v1295_v29, %v1294_v27 }
 0x252   : > { %v1261_v32 = vadd.f32 %v1260_v30, %v1259_v28  ;;  %v1297_v33 = vrot.slane %v1296_v31, 2 }
 0x254   : > { %v1262_v34 = vrot.slane %v1261_v32, 1  ;;  %v1298_v35 = vadd.f32 %v1297_v33, %v1296_v31 }
 0x256   : > { %v1299_v36 = vrot.slane %v1298_v35, 1  ;;  %v1263_v37 = vadd.f32 %v1262_v34, %v1261_v32 }
 0x258   : > { %v1300_v38 = vadd.f32 %v1299_v36, %v1298_v35 }
 0x25a   : > { %v1302_v39 = vsel %vm1301_vm2, %v1263_v37, %v1300_v38 }
 0x25b   : > { %1303 = vst [vmem:[%s2148_s17] sm:$0x3] %v1302_v39 }
 0x25c PF: > { %s1549_s15 = sshll.u32 %s1943_s11, 11  ;;  %s1323_s25 = sshll.u32 %s2146_s9, 4  ;;  %s2314_s25 = int_to_ptr.vmem [resolvable:$true] %s1323_s25 }
 0x25d   : > { %s2311_s10 = scalar_lea.hbm %s2406_s7, %s1549_s15  ;;  %s1305_s22 = scalar_lea.sflag [#allocation5], %s2128_s18 }
 0x25e   : > { %s1813_s19 = scalar_lea.vmem %s2314_s25, 2048  ;;  %s1958_s30 = smov [#allocation4]  }
 0x25f   : > { %p1814_p8 = scmp.ne.s32.totalorder %s2314_s25, %s1813_s19  ;;  %s1817_s27 = sshll.u32 %s1958_s30, 4  ;;  %s1818_s27 = int_to_ptr.vmem [resolvable:$false] %s1817_s27 }
 0x260   : > { %s1819_s0 = scalar_lea.vmem %s1818_s27, 4096  ;;  %p1820_p11 = scmp.lt.s32.totalorder %s2314_s25, %s1818_s27 }
 0x261   : > { %p1815_p9 = pnand %p1814_p8, %p2079_p7  ;;  %p1821_p13 = scmp.lt.s32.totalorder %s1819_s0, %s1813_s19 }
 0x263   : > { %p1816_p10 = pneg %p1815_p9  ;;  %p1822_p0 = por %p1821_p13, %p1820_p11 }
 0x265   : > { %p1823_p1 = pnand %p1822_p0, %p1816_p10 }
 0x267   : > { %1826 = shalt.err (!%p1823_p1)
}
 0x268   : > { %s1827_s9 = scalar_lea.hbm %s2311_s10, 2048  ;;  %s1831_s21 = scalar_lea.hbm %s2406_s7, 4096 }
 0x269   : > { %p1828_p2 = scmp.ne.s32.totalorder %s2311_s10, %s1827_s9  ;;  %p1832_p5 = scmp.lt.u32.totalorder %s2311_s10, %s2406_s7 }
 0x26a   : > { %p1833_p6 = scmp.lt.u32.totalorder %s1831_s21, %s1827_s9  ;;  %p1835_p9 = scmp.lt.u32.totalorder %s1827_s9, %s2311_s10 }
 0x26b   : > { %p1829_p3 = pnand %p1828_p2, %p2079_p7 }
 0x26c   : > { %p1834_p8 = por %p1833_p6, %p1832_p5 }
 0x26d   : > { %p1830_p4 = pneg %p1829_p3 }
 0x26e   : > { %p1836_p10 = por %p1835_p9, %p1834_p8 }
 0x270   : > { %p1837_p11 = pnand %p1836_p10, %p1830_p4 }
 0x272   : > { %1840 = shalt.err (!%p1837_p11)
}
 0x273   : > { %s1959_s15 = smov 128   ;;  %s1960_s20 = smov 8  }
 0x274   : > { %1686 = dma.vmem_to_hbm [thread:$0]  (%p2079_p7), %s2314_s25, 2048, %s2311_s10, %s1305_s22, %s1959_s15, %s1959_s15, %s1960_s20  }
 0x275   : > { %s1545_s24 = sshll.u32 %s1943_s11, 5  ;;  %s1339_s19 = sshll.u32 %s2148_s17, 4  ;;  %s1340_s19 = int_to_ptr.vmem [resolvable:$true] %s1339_s19 }
 0x276   : > { %s2345_s0 = scalar_lea.hbm %s2407_s8, %s1545_s24  ;;  %s1310_s9 = scalar_lea.sflag [#allocation7], %s2128_s18 }
 0x277   : > { %s1841_s12 = scalar_lea.vmem %s1340_s19, 32  ;;  %s1961_s13 = smov [#allocation6]  }
 0x278   : > { %p1842_p13 = scmp.ne.s32.totalorder %s1340_s19, %s1841_s12  ;;  %s1845_s21 = sshll.u32 %s1961_s13, 4  ;;  %s1846_s21 = int_to_ptr.vmem [resolvable:$false] %s1845_s21 }
 0x279   : > { %s1847_s26 = scalar_lea.vmem %s1846_s21, 64  ;;  %p1848_p2 = scmp.lt.s32.totalorder %s1340_s19, %s1846_s21 }
 0x27a   : > { %p1843_p0 = pnand %p1842_p13, %p2079_p7  ;;  %p1849_p3 = scmp.lt.s32.totalorder %s1847_s26, %s1841_s12 }
 0x27c   : > { %p1844_p1 = pneg %p1843_p0  ;;  %p1850_p4 = por %p1849_p3, %p1848_p2 }
 0x27e   : > { %p1851_p5 = pnand %p1850_p4, %p1844_p1 }
 0x280   : > { %1854 = shalt.err (!%p1851_p5)
}
 0x281   : > { %s1855_s11 = scalar_lea.hbm %s2345_s0, 32  ;;  %s1859_s10 = scalar_lea.hbm %s2407_s8, 64 }
 0x282   : > { %p1856_p6 = scmp.ne.s32.totalorder %s2345_s0, %s1855_s11  ;;  %p1860_p10 = scmp.lt.u32.totalorder %s2345_s0, %s2407_s8 }
 0x283   : > { %p1861_p11 = scmp.lt.u32.totalorder %s1859_s10, %s1855_s11  ;;  %p1863_p0 = scmp.lt.u32.totalorder %s1855_s11, %s2345_s0 }
 0x284   : > { %p1857_p8 = pnand %p1856_p6, %p2079_p7 }
 0x285   : > { %p1862_p13 = por %p1861_p11, %p1860_p10 }
 0x286   : > { %p1858_p9 = pneg %p1857_p8 }
 0x287   : > { %p1864_p1 = por %p1863_p0, %p1862_p13 }
 0x289   : > { %p1865_p2 = pnand %p1864_p1, %p1858_p9 }
 0x28b   : > { %1868 = shalt.err (!%p1865_p2)
}
 0x28c   : > { %1687 = dma.vmem_to_hbm [thread:$0]  (%p2079_p7), %s1340_s19, 32, %s2345_s0, %s1310_s9  }
 0x28d PF: > { %s2429_s16 = sld [smem:[#allocation10_spill]]  ;;  %p1697_p3 = scmp.ge.s32.totalorder %s1955_s14, 2 }
 0x28f   : > { %p1691_p4 = pnand %p1697_p3, %p2087_p12 }
 0x293   : > { %s1351_s20 = sand.u32 1, %s2429_s16  }
 0x294   : > { %s1352_s24 = scalar_lea.sflag [#allocation5], %s1351_s20 }
 0x295   : > { %1910 = dma.done.wait (!%p1691_p4), %s1352_s24, 2048  }
 0x296   : > { %1912 = vsyncadd (!%p1691_p4), %s1352_s24, 4294965248  ;;  %s1361_s30 = scalar_lea.sflag [#allocation7], %s1351_s20 }
 0x297   : > { %1914 = dma.done.wait (!%p1691_p4), %s1361_s30, 32  }
 0x298   : > { %1916 = vsyncadd (!%p1691_p4), %s1361_s30, 4294967264  ;;  %s25_s14 = sadd.s32 1, %s1955_s14   ;;  %s2431_s23 = sld [smem:[#allocation17_spill]] }
 0x299   : > { %p22_p5 = scmp.ge.s32.totalorder %s25_s14, 6   ;;  %s2432_s30 = sld [smem:[#allocation11_spill]] }
 0x29a   : > { %s2433_s9 = sld [smem:[#allocation18_spill]]  ;;  %s2434_s10 = sld [smem:[#allocation12_spill]] }
 0x29b   : > { %s2435_s11 = sld [smem:[#allocation13_spill]]  ;;  %s2436_s12 = sld [smem:[#allocation14_spill]] }
 0x29c   : > { %s2437_s13 = sld [smem:[#allocation15_spill]]  ;;  %s2438_s27 = smov %s1923_s28 }
 0x29d   : > { %s2439_s28 = smov %s1927_s29  ;;  %24 = sbr.rel (!%p22_p5) target bundleno = 10 (0xa), region = 160 }
 0x29e   : > { %s2440_s29 = smov %s2431_s23 }
 0x2a4   :  { %1366 = vsyncpa [#allocation5], 1 }
 0x2a5   :  { %1368 = vsyncpa [#allocation5 + $0x1], 1 }
 0x2a6   :  { %1369 = vsyncpa [#allocation7], 1 }
 0x2a7   :  { %1371 = vsyncpa [#allocation7 + $0x1], 1 }

</bundles_post_ra>
